<compile_context>
chip_gen: v7x
topology: tpu7x:2x2x1
jax: 0.10.0
libtpu: 0.0.40
codegen_flags: <defaults>
</compile_context>

<pallas_src>
import functools

import jax
import jax.numpy as jnp
from jax.experimental import pallas as pl
from jax.experimental.pallas import tpu as pltpu


_LANE = 128
_VMEM_BUDGET_BYTES = 40 * 1024 * 1024   # working-set target (fits v7x 64 MiB/TC)
_VMEM_LIMIT_BYTES = 48 * 1024 * 1024    # ~75% of v7x per-TC VMEM; ok on v5e/v6e
_INV_SQRT2 = 0.7071067811865476


# ---------------------------------------------------------------------------
# Tile sizing helpers (fixed, modest targets; never scale toward VMEM capacity)
# ---------------------------------------------------------------------------

def _sublane_pack(dtype):
    # rows per packed sublane group: 8 for f32, 16 for bf16, 32 for int8/fp8
    return 8 * max(1, 4 // jnp.dtype(dtype).itemsize)


def _round_up(x, m):
    return ((x + m - 1) // m) * m


def _align_rows(m, target, dtype):
    """Row tile: full extent if it already fits the target, else a sublane-pack
    multiple <= target (cdiv grid, masked tail)."""
    pack = _sublane_pack(dtype)
    target = max(pack, (target // pack) * pack)
    return m if m <= target else target


def _align_lanes(n, target):
    """Lane tile: full extent if <= target, else a 128-multiple <= target
    (cdiv grid, masked tail; still lane-dense stores)."""
    target = max(_LANE, (target // _LANE) * _LANE)
    return n if n <= target else target


def _align_reduce(k, target):
    """Reduction tile: full extent, or the largest 128-multiple divisor <=
    target.  If none exists the caller must zero-pad K (never a masked K tail:
    garbage would enter the accumulator)."""
    target = max(_LANE, (target // _LANE) * _LANE)
    if k <= target:
        return k, False
    t = target
    while t >= _LANE:
        if k % t == 0:
            return t, False
        t -= _LANE
    return target, True


def _shrink_lane(t):
    return max(_LANE, ((t // 2) // _LANE) * _LANE)


def _shrink_rows(t, dtype):
    pack = _sublane_pack(dtype)
    return max(pack, ((t // 2) // pack) * pack)


# ---------------------------------------------------------------------------
# In-kernel exact erf / GELU (A&S 7.1.26; avoids relying on a Mosaic erf rule)
# ---------------------------------------------------------------------------

def _erf_approx_f32(x):
    a1, a2, a3, a4, a5 = (0.254829592, -0.284496736, 1.421413741,
                          -1.453152027, 1.061405429)
    p = 0.3275911
    ax = jnp.abs(x)
    t = 1.0 / (1.0 + p * ax)
    poly = ((((a5 * t + a4) * t + a3) * t + a2) * t + a1) * t
    y = 1.0 - poly * jnp.exp(-ax * ax)          # exp -> EUP slot
    return jnp.where(x >= 0.0, y, -y)


def _gelu_exact_f32(x):
    # torch nn.GELU() default (exact erf form), evaluated in f32.
    return 0.5 * x * (1.0 + _erf_approx_f32(x * _INV_SQRT2))


# ---------------------------------------------------------------------------
# Fused RMSNorm -> fc1 (+bias) -> exact GELU kernel
# ---------------------------------------------------------------------------

def _rmsnorm_fc1_gelu_kernel(x_ref, lnw_ref, w_ref, b_ref, o_ref, xn_ref,
                             *, eps, inv_hidden, input_dtype):
    # x_ref:   (tm, K)  raw activation rows (full K extent)
    # lnw_ref: (1, K)   RMSNorm weight
    # w_ref:   (K, tn)  fc1 weight slice
    # b_ref:   (1, tn)  fc1 bias slice
    # o_ref:   (tm, tn) output tile
    # xn_ref:  (tm, K)  scratch: normalized rows, cached across the N ("j") axis

    @pl.when(pl.program_id(1) == 0)
    def _():
        x = x_ref[...].astype(jnp.float32)
        # sum * (1/H) instead of mean (one VPU mul, no divide)
        var = jnp.sum(x * x, axis=-1, keepdims=True) * inv_hidden
        xn = (x * jax.lax.rsqrt(var + eps)).astype(input_dtype)  # torch order:
        xn_ref[...] = (lnw_ref[...] * xn).astype(xn_ref.dtype)   # downcast, then *w

    acc = jnp.dot(xn_ref[...], w_ref[...], preferred_element_type=jnp.float32)
    acc = acc + b_ref[...].astype(jnp.float32)
    o_ref[...] = _gelu_exact_f32(acc).astype(o_ref.dtype)


def fused_rmsnorm_linear_gelu(x, ln_w, w, b, *, eps=1e-6, compute_dtype=None,
                              tm_target=256, tn_target=512):
    """GELU(RMSNorm(x) @ w + b), w stored (in, out) == torch weight.T."""
    M, K = x.shape
    K2, N = w.shape
    assert K == K2 and b.shape == (N,) and ln_w.shape == (K,)

    input_dtype = x.dtype
    if compute_dtype is None:
        compute_dtype = jnp.promote_types(ln_w.dtype, input_dtype)
    out_dtype = compute_dtype
    if w.dtype != compute_dtype:
        w = w.astype(compute_dtype)          # cast MXU operand at the boundary

    tm = _align_rows(M, tm_target, input_dtype)
    tn = _align_lanes(N, tn_target)

    xb = jnp.dtype(input_dtype).itemsize
    cb = jnp.dtype(compute_dtype).itemsize
    ob = jnp.dtype(out_dtype).itemsize

    def need(tm_, tn_):
        n = 2 * tm_ * K * xb          # x blocks (double-buffered)
        n += tm_ * K * cb             # xn scratch
        n += 2 * tm_ * K * 4          # f32 temps in the norm prologue
        n += 2 * K * tn_ * cb         # fc1 weight blocks
        n += 2 * tn_ * cb             # bias blocks
        n += 2 * tm_ * tn_ * ob       # output blocks
        n += 2 * tm_ * tn_ * 4        # f32 acc + gelu temps
        n += 2 * K * 4                # ln weight block
        return n

    pack = _sublane_pack(input_dtype)
    while need(tm, tn) > _VMEM_BUDGET_BYTES:
        if tn > _LANE and tn % _LANE == 0:
            tn = _shrink_lane(tn)
        elif tm > pack and tm % pack == 0:
            tm = _shrink_rows(tm, input_dtype)
        else:
            break

    grid = (pl.cdiv(M, tm), pl.cdiv(N, tn))

    kernel = functools.partial(
        _rmsnorm_fc1_gelu_kernel, eps=float(eps), inv_hidden=1.0 / float(K),
        input_dtype=input_dtype)

    return pl.pallas_call(
        kernel,
        out_shape=jax.ShapeDtypeStruct((M, N), out_dtype),
        grid=grid,
        in_specs=[
            pl.BlockSpec((tm, K), lambda i, j: (i, 0)),   # activation rows
            pl.BlockSpec((1, K), lambda i, j: (0, 0)),    # RMSNorm weight
            pl.BlockSpec((K, tn), lambda i, j: (0, j)),   # fc1 weight
            pl.BlockSpec((1, tn), lambda i, j: (0, j)),   # fc1 bias
        ],
        out_specs=pl.BlockSpec((tm, tn), lambda i, j: (i, j)),
        scratch_shapes=[pltpu.VMEM((tm, K), compute_dtype)],
        compiler_params=pltpu.CompilerParams(
            # M rows shard across v7x's 2 TensorCores; the N axis must stay
            # sequential ("arbitrary") because the normalized-rows scratch is
            # written at j==0 and reused for j>0.
            dimension_semantics=("parallel", "arbitrary"),
            vmem_limit_bytes=_VMEM_LIMIT_BYTES),
    )(x, ln_w.reshape(1, K), w, b.astype(compute_dtype).reshape(1, N))


# ---------------------------------------------------------------------------
# fc2: tiled MXU matmul + bias
# ---------------------------------------------------------------------------

def _linear_bias_kernel(x_ref, w_ref, b_ref, o_ref, acc_ref):
    k = pl.program_id(2)
    part = jnp.dot(x_ref[...], w_ref[...], preferred_element_type=jnp.float32)

    @pl.when(k == 0)
    def _():
        acc_ref[...] = part          # direct write: no zero-init + RMW pass

    @pl.when(k > 0)
    def _():
        acc_ref[...] += part

    @pl.when(k == pl.num_programs(2) - 1)
    def _():
        o_ref[...] = (acc_ref[...] + b_ref[...].astype(jnp.float32)
                      ).astype(o_ref.dtype)


def pallas_linear(x, w, b, *, compute_dtype=None,
                  tm_target=256, tn_target=512, tk_target=1024):
    """y = x @ w + b, with w stored (in, out) == torch weight.T."""
    M, K = x.shape
    K2, N = w.shape
    assert K == K2 and b.shape == (N,)

    if compute_dtype is not None:
        x = x.astype(compute_dtype)
        w = w.astype(compute_dtype)
        out_dtype = compute_dtype
    else:
        out_dtype = jnp.promote_types(x.dtype, w.dtype)

    # Lane-dense output: pad N up to a 128 multiple (zero weight/bias columns)
    # so stores are unmasked vst, then slice afterwards.
    N_pad = N if N % _LANE == 0 else _round_up(N, _LANE)
    if N_pad != N:
        w = jnp.pad(w, ((0, 0), (0, N_pad - N)))
        b = jnp.pad(b, (0, N_pad - N))

    tk, pad_k = _align_reduce(K, tk_target)
    if pad_k:
        # Zero-pad K (never a masked K tail: garbage would hit the accumulator).
        K_pad = _round_up(K, tk)
        x = jnp.pad(x, ((0, 0), (0, K_pad - K)))
        w = jnp.pad(w, ((0, K_pad - K), (0, 0)))
        K = K_pad

    tm = _align_rows(M, tm_target, x.dtype)
    tn = _align_lanes(N_pad, tn_target)

    xb = jnp.dtype(x.dtype).itemsize
    wb = jnp.dtype(w.dtype).itemsize
    ob = jnp.dtype(out_dtype).itemsize

    def need(tm_, tn_):
        n = 2 * tm_ * tk * xb + 2 * tk * tn_ * wb + 2 * tn_ * wb
        n += 2 * tm_ * tn_ * ob + tm_ * tn_ * 4       # out blocks + f32 acc
        return n

    pack = _sublane_pack(x.dtype)
    while need(tm, tn) > _VMEM_BUDGET_BYTES:
        if tn > _LANE and tn % _LANE == 0:
            tn = _shrink_lane(tn)
        elif tm > pack and tm % pack == 0:
            tm = _shrink_rows(tm, x.dtype)
        else:
            break

    grid = (pl.cdiv(M, tm), pl.cdiv(N_pad, tn), K // tk)

    out = pl.pallas_call(
        _linear_bias_kernel,
        out_shape=jax.ShapeDtypeStruct((M, N_pad), out_dtype),
        grid=grid,
        in_specs=[
            pl.BlockSpec((tm, tk), lambda i, j, k: (i, k)),
            pl.BlockSpec((tk, tn), lambda i, j, k: (k, j)),
            pl.BlockSpec((1, tn), lambda i, j, k: (0, j)),
        ],
        out_specs=pl.BlockSpec((tm, tn), lambda i, j, k: (i, j)),
        scratch_shapes=[pltpu.VMEM((tm, tn), jnp.float32)],
        compiler_params=pltpu.CompilerParams(
            dimension_semantics=("parallel", "parallel", "arbitrary"),
            vmem_limit_bytes=_VMEM_LIMIT_BYTES),
    )(x, w, b.reshape(1, N_pad))

    return out[:, :N] if N_pad != N else out


# ---------------------------------------------------------------------------
# S2Compressor pieces with no TensorCore compute
# ---------------------------------------------------------------------------

def flat_square_2x2(x, thw, spatial_merge_size):
    """JAX mirror of S2Compressor.flat_square_2x2 (pure layout plumbing)."""
    c = x.shape[-1]
    t, h, w = int(thw[0]), int(thw[1]), int(thw[2])
    h = h // spatial_merge_size
    w = w // spatial_merge_size
    x = x.reshape(t, h, w, c)
    if h % 2 != 0:
        x = jnp.concatenate([x, jnp.zeros((t, 1, w, c), dtype=x.dtype)], axis=1)
        h += 1
    if w % 2 != 0:
        x = jnp.concatenate([x, jnp.zeros((t, h, 1, c), dtype=x.dtype)], axis=2)
        w += 1
    x = x.reshape(t, h // 2, w, c * 2)
    x = jnp.transpose(x, (0, 2, 1, 3))
    x = x.reshape(t, w // 2, h // 2, c * 4)
    x = jnp.transpose(x, (0, 2, 1, 3))
    new_thw = (t, (h // 2) * spatial_merge_size, (w // 2) * spatial_merge_size)
    return x.reshape(-1, c * 4), new_thw


def s2_compressor_visual_forward(x, grid_thw, params, *, spatial_merge_size=2,
                                 eps=1e-6, compute_dtype=None):
    """Visual-embedding path of S2Compressor.forward for one visual input:
    flat_square_2x2 -> [RMSNorm + fc1 + GELU] (one Pallas kernel) ->
    fc2 (Pallas)."""
    merged, new_thw = flat_square_2x2(x, grid_thw, spatial_merge_size)
    h = fused_rmsnorm_linear_gelu(merged, params["ln_q_weight"],
                                  params["fc1_w"], params["fc1_b"],
                                  eps=eps, compute_dtype=compute_dtype)
    h = pallas_linear(h, params["fc2_w"], params["fc2_b"],
                      compute_dtype=compute_dtype)
    return h, new_thw


# ---------------------------------------------------------------------------
# Pure-JAX reference (mirrors torch semantics)
# ---------------------------------------------------------------------------

def qwen2_rmsnorm_ref(hidden_states, weight, eps=1e-6):
    input_dtype = hidden_states.dtype
    x = hidden_states.astype(jnp.float32)
    variance = jnp.mean(x * x, axis=-1, keepdims=True)
    x = x * jax.lax.rsqrt(variance + eps)
    return weight * x.astype(input_dtype)


def gelu_exact_ref(x):
    return 0.5 * x * (1.0 + jax.lax.erf(x * _INV_SQRT2))


def s2_compressor_visual_ref(x, grid_thw, params, *, spatial_merge_size=2,
                             eps=1e-6):
    merged, new_thw = flat_square_2x2(x, grid_thw, spatial_merge_size)
    h = qwen2_rmsnorm_ref(merged, params["ln_q_weight"], eps=eps)
    h = jnp.dot(h, params["fc1_w"],
                precision=jax.lax.Precision.HIGHEST) + params["fc1_b"]
    h = gelu_exact_ref(h)
    h = jnp.dot(h, params["fc2_w"],
                precision=jax.lax.Precision.HIGHEST) + params["fc2_b"]
    return h, new_thw


if __name__ == "__main__":
    key = jax.random.PRNGKey(0)
    k_x, k_w1, k_b1, k_w2, k_b2 = jax.random.split(key, 5)

    dim = 32                        # visual channel dim -> hidden_size = 128
    spatial_merge_size = 2
    hidden_size = dim * 4
    grid_thw = (1, 16, 16)          # one image: t=1, h=16, w=16
    n_visual = (grid_thw[0] * grid_thw[1] * grid_thw[2]) // (spatial_merge_size ** 2)

    x = jax.random.normal(k_x, (n_visual, dim), dtype=jnp.float32)

    params = {
        # torch init: nn.Parameter(torch.ones(hidden_size))
        "ln_q_weight": jnp.ones((hidden_size,), dtype=jnp.float32),
        # nn.Linear weights stored as (in, out) == torch weight.T
        "fc1_w": 0.05 * jax.random.normal(k_w1, (hidden_size, hidden_size),
                                          dtype=jnp.float32),
        "fc1_b": 0.01 * jax.random.normal(k_b1, (hidden_size,), dtype=jnp.float32),
        "fc2_w": 0.05 * jax.random.normal(k_w2, (hidden_size, dim),
                                          dtype=jnp.float32),
        "fc2_b": 0.01 * jax.random.normal(k_b2, (dim,), dtype=jnp.float32),
    }

    out, new_thw = s2_compressor_visual_forward(
        x, grid_thw, params, spatial_merge_size=spatial_merge_size, eps=1e-6)
    out = jax.block_until_ready(out)

    ref, ref_thw = s2_compressor_visual_ref(
        x, grid_thw, params, spatial_merge_size=spatial_merge_size, eps=1e-6)
    ref = jax.block_until_ready(ref)

    assert out.shape == ref.shape == (16, dim), (out.shape, ref.shape)
    assert out.dtype == ref.dtype
    assert new_thw == ref_thw == (1, 8, 8)
    assert bool(jnp.allclose(out, ref, atol=2e-2, rtol=2e-2)), (
        float(jnp.max(jnp.abs(out - ref))))

    print("KERNEL_OK")
</pallas_src>

<mosaic_0001>
module attributes {stable_mosaic.version = 11 : i64} {
  func.func @_rmsnorm_fc1_gelu_kernel(%arg0: i32, %arg1: i32, %arg2: memref<16x128xf32, #tpu.memory_space<vmem>>, %arg3: memref<1x128xf32, #tpu.memory_space<vmem>>, %arg4: memref<128x128xf32, #tpu.memory_space<vmem>>, %arg5: memref<1x128xf32, #tpu.memory_space<vmem>>, %arg6: memref<16x128xf32, #tpu.memory_space<vmem>>, %arg7: memref<16x128xf32, #tpu.memory_space<vmem>>) attributes {dimension_semantics = [#tpu.dimension_semantics<parallel>, #tpu.dimension_semantics<arbitrary>], iteration_bounds = array<i64: 1, 1>, scalar_prefetch = 0 : i64, scratch_operands = 1 : i64, tpu.core_type = #tpu.core_type<tc>, window_params = [{transform_indices = @transform_0, window_bounds = array<i64: 16, 128>}, {pipeline_mode = #tpu.pipeline_mode<synchronous>, transform_indices = @transform_1, window_bounds = array<i64: 1, 128>}, {transform_indices = @transform_2, window_bounds = array<i64: 128, 128>}, {transform_indices = @transform_3, window_bounds = array<i64: 1, 128>}, {transform_indices = @transform_4, window_bounds = array<i64: 16, 128>}]} {
    %c0_i32 = arith.constant 0 : i32
    %0 = arith.cmpi eq, %arg1, %c0_i32 : i32
    %1 = arith.extui %0 : i1 to i32
    %c0_i32_0 = arith.constant 0 : i32
    %2 = arith.cmpi ne, %1, %c0_i32_0 : i32
    scf.if %2 {
      %c0_23 = arith.constant 0 : index
      %c0_24 = arith.constant 0 : index
      %50 = vector.load %arg2[%c0_23, %c0_24] : memref<16x128xf32, #tpu.memory_space<vmem>>, vector<16x128xf32>
      %51 = arith.mulf %50, %50 : vector<16x128xf32>
      %cst_25 = arith.constant dense<0.000000e+00> : vector<16xf32>
      %52 = vector.multi_reduction <add>, %51, %cst_25 [1] : vector<16x128xf32> to vector<16xf32>
      %53 = vector.shape_cast %52 : vector<16xf32> to vector<16x1xf32>
      %cst_26 = arith.constant 7.812500e-03 : f32
      %54 = vector.broadcast %cst_26 : f32 to vector<16x1xf32>
      %55 = arith.mulf %53, %54 : vector<16x1xf32>
      %cst_27 = arith.constant 9.99999997E-7 : f32
      %56 = vector.broadcast %cst_27 : f32 to vector<16x1xf32>
      %57 = arith.addf %55, %56 : vector<16x1xf32>
      %58 = math.rsqrt %57 : vector<16x1xf32>
      %59 = vector.broadcast %58 : vector<16x1xf32> to vector<16x128xf32>
      %60 = arith.mulf %50, %59 : vector<16x128xf32>
      %c0_28 = arith.constant 0 : index
      %c0_29 = arith.constant 0 : index
      %61 = vector.load %arg3[%c0_28, %c0_29] : memref<1x128xf32, #tpu.memory_space<vmem>>, vector<1x128xf32>
      %62 = vector.broadcast %61 : vector<1x128xf32> to vector<16x128xf32>
      %63 = arith.mulf %62, %60 : vector<16x128xf32>
      %c0_30 = arith.constant 0 : index
      %c0_31 = arith.constant 0 : index
      %64 = vector.load %arg7[%c0_30, %c0_31] : memref<16x128xf32, #tpu.memory_space<vmem>>, vector<16x128xf32>
      tpu.vector_store %arg7[%c0_30, %c0_31], %63 {strides = array<i32>} : memref<16x128xf32, #tpu.memory_space<vmem>>, vector<16x128xf32>,
    } else {
    }
    %c0 = arith.constant 0 : index
    %c0_1 = arith.constant 0 : index
    %3 = vector.load %arg7[%c0, %c0_1] : memref<16x128xf32, #tpu.memory_space<vmem>>, vector<16x128xf32>
    %c0_2 = arith.constant 0 : index
    %c0_3 = arith.constant 0 : index
    %4 = vector.load %arg4[%c0_2, %c0_3] : memref<128x128xf32, #tpu.memory_space<vmem>>, vector<128x128xf32>
    %cst = arith.constant dense<0.000000e+00> : vector<16x128xf32>
    %5 = tpu.matmul %3, %4, %cst {dimension_numbers = #tpu.dot_dimension_numbers<[1], [0], [0], [1], [0, 0, 1, 1], [], []>} : vector<16x128xf32>, vector<128x128xf32>, vector<16x128xf32> -> vector<16x128xf32>
    %c0_4 = arith.constant 0 : index
    %c0_5 = arith.constant 0 : index
    %6 = vector.load %arg5[%c0_4, %c0_5] : memref<1x128xf32, #tpu.memory_space<vmem>>, vector<1x128xf32>
    %7 = vector.broadcast %6 : vector<1x128xf32> to vector<16x128xf32>
    %8 = arith.addf %5, %7 : vector<16x128xf32>
    %cst_6 = arith.constant 5.000000e-01 : f32
    %9 = vector.broadcast %cst_6 : f32 to vector<16x128xf32>
    %10 = arith.mulf %9, %8 : vector<16x128xf32>
    %cst_7 = arith.constant 0.707106769 : f32
    %11 = vector.broadcast %cst_7 : f32 to vector<16x128xf32>
    %12 = arith.mulf %8, %11 : vector<16x128xf32>
    %13 = math.absf %12 : vector<16x128xf32>
    %cst_8 = arith.constant 0.327591091 : f32
    %14 = vector.broadcast %cst_8 : f32 to vector<16x128xf32>
    %15 = arith.mulf %14, %13 : vector<16x128xf32>
    %cst_9 = arith.constant 1.000000e+00 : f32
    %16 = vector.broadcast %cst_9 : f32 to vector<16x128xf32>
    %17 = arith.addf %16, %15 : vector<16x128xf32>
    %cst_10 = arith.constant 1.000000e+00 : f32
    %18 = vector.broadcast %cst_10 : f32 to vector<16x128xf32>
    %19 = arith.divf %18, %17 : vector<16x128xf32>
    %cst_11 = arith.constant 1.06140542 : f32
    %20 = vector.broadcast %cst_11 : f32 to vector<16x128xf32>
    %21 = arith.mulf %20, %19 : vector<16x128xf32>
    %cst_12 = arith.constant -1.45315206 : f32
    %22 = vector.broadcast %cst_12 : f32 to vector<16x128xf32>
    %23 = arith.addf %21, %22 : vector<16x128xf32>
    %24 = arith.mulf %23, %19 : vector<16x128xf32>
    %cst_13 = arith.constant 1.42141378 : f32
    %25 = vector.broadcast %cst_13 : f32 to vector<16x128xf32>
    %26 = arith.addf %24, %25 : vector<16x128xf32>
    %27 = arith.mulf %26, %19 : vector<16x128xf32>
    %cst_14 = arith.constant -0.284496725 : f32
    %28 = vector.broadcast %cst_14 : f32 to vector<16x128xf32>
    %29 = arith.addf %27, %28 : vector<16x128xf32>
    %30 = arith.mulf %29, %19 : vector<16x128xf32>
    %cst_15 = arith.constant 0.254829586 : f32
    %31 = vector.broadcast %cst_15 : f32 to vector<16x128xf32>
    %32 = arith.addf %30, %31 : vector<16x128xf32>
    %33 = arith.mulf %32, %19 : vector<16x128xf32>
    %cst_16 = arith.constant 0.000000e+00 : f32
    %34 = vector.broadcast %cst_16 : f32 to vector<16x128xf32>
    %35 = arith.subf %34, %13 : vector<16x128xf32>
    %36 = arith.mulf %35, %13 : vector<16x128xf32>
    %37 = math.exp %36 : vector<16x128xf32>
    %38 = arith.mulf %33, %37 : vector<16x128xf32>
    %cst_17 = arith.constant 1.000000e+00 : f32
    %39 = vector.broadcast %cst_17 : f32 to vector<16x128xf32>
    %40 = arith.subf %39, %38 : vector<16x128xf32>
    %cst_18 = arith.constant 0.000000e+00 : f32
    %41 = vector.broadcast %cst_18 : f32 to vector<16x128xf32>
    %42 = arith.cmpf oge, %12, %41 : vector<16x128xf32>
    %cst_19 = arith.constant 0.000000e+00 : f32
    %43 = vector.broadcast %cst_19 : f32 to vector<16x128xf32>
    %44 = arith.subf %43, %40 : vector<16x128xf32>
    %45 = arith.select %42, %40, %44 : vector<16x128xi1>, vector<16x128xf32>
    %cst_20 = arith.constant 1.000000e+00 : f32
    %46 = vector.broadcast %cst_20 : f32 to vector<16x128xf32>
    %47 = arith.addf %46, %45 : vector<16x128xf32>
    %48 = arith.mulf %10, %47 : vector<16x128xf32>
    %c0_21 = arith.constant 0 : index
    %c0_22 = arith.constant 0 : index
    %49 = vector.load %arg6[%c0_21, %c0_22] : memref<16x128xf32, #tpu.memory_space<vmem>>, vector<16x128xf32>
    tpu.vector_store %arg6[%c0_21, %c0_22], %48 {strides = array<i32>} : memref<16x128xf32, #tpu.memory_space<vmem>>, vector<16x128xf32>,
    return
  }
  func.func @transform_0(%arg0: i32, %arg1: i32) -> (i32, i32) {
    %c0_i32 = arith.constant 0 : i32
    %c0_i32_0 = arith.constant 0 : i32
    return %arg0, %c0_i32 : i32, i32
  }
  func.func @transform_1(%arg0: i32, %arg1: i32) -> (i32, i32) {
    %c0_i32 = arith.constant 0 : i32
    %c0_i32_0 = arith.constant 0 : i32
    %c0_i32_1 = arith.constant 0 : i32
    return %c0_i32, %c0_i32_0 : i32, i32
  }
  func.func @transform_2(%arg0: i32, %arg1: i32) -> (i32, i32) {
    %c0_i32 = arith.constant 0 : i32
    %c0_i32_0 = arith.constant 0 : i32
    return %c0_i32, %arg1 : i32, i32
  }
  func.func @transform_3(%arg0: i32, %arg1: i32) -> (i32, i32) {
    %c0_i32 = arith.constant 0 : i32
    %c0_i32_0 = arith.constant 0 : i32
    return %c0_i32, %arg1 : i32, i32
  }
  func.func @transform_4(%arg0: i32, %arg1: i32) -> (i32, i32) {
    %c0_i32 = arith.constant 0 : i32
    return %arg0, %arg1 : i32, i32
  }
}

</mosaic_0001>

<bundles_post_ra>
// kernel: tpu_custom_call.1
= control target key start
LH: loop header
LB: loop body
LE: loop exit
PB: predicated region body
PF: predicated region fallthrough
CT: control target
= control target key end

     0   :  { %9 = vsyncpa [#allocation4], 0  ;;  %s508_s0 = inlined_call_operand.hbm [shape: f32[16,128], index: 0, kind: input, shape index: {}]   ;;  %s509_s1 = inlined_call_operand.vmem [shape: f32[1,128], index: 1, kind: input, shape index: {}]   ;;  %s510_s2 = inlined_call_operand.hbm [shape: f32[128,128], index: 2, kind: input, shape index: {}]   ;;  %s511_s3 = inlined_call_operand.vmem [shape: f32[1,128], index: 3, kind: input, shape index: {}]   ;;  %s512_s4 = inlined_call_operand.hbm [shape: f32[16,128], index: 4, kind: output, shape index: {}]  }
   0x1   :  { %10 = vsyncpa [#allocation7], 0 }
   0x2   :  { %11 = vsyncpa [#allocation5], 0  ;;  %s427_s15 = smov [#allocation3]   ;;  %s355_s19 = scalar_lea.hbm %s508_s0, 256 }
   0x3   :  { %s17_s16 = sshll.u32 %s427_s15, 4  ;;  %p356_p0 = scmp.ne.s32.totalorder %s508_s0, %s355_s19  ;;  %s18_s16 = int_to_ptr.vmem [resolvable:$true] %s17_s16 }
   0x4   :  { %p359_p1 = scmp.lt.u32.totalorder %s355_s19, %s508_s0 }
   0x6   :  { %p361_p2 = pnand %p359_p1, %p356_p0 }
   0x8   :  { %364 = shalt.err (!%p361_p2)
}
   0x9   :  { %s365_s24 = scalar_lea.vmem %s18_s16, 256  ;;  %p370_p4 = scmp.lt.s32.totalorder %s18_s16, %s18_s16 }
   0xa   :  { %p366_p3 = scmp.ne.s32.totalorder %s18_s16, %s365_s24  ;;  %p371_p5 = scmp.lt.s32.totalorder %s365_s24, %s365_s24 }
   0xc   :  { %p372_p6 = por %p371_p5, %p370_p4 }
   0xe   :  { %p373_p7 = pnand %p372_p6, %p366_p3 }
  0x10   :  { %376 = shalt.err (!%p373_p7)
}
  0x11   :  { %s428_s25 = smov 128   ;;  %s429_s26 = smov 8  }
  0x12   :  { %23 = dma.hbm_to_vmem [thread:$0]  %s508_s0, 256, %s18_s16, [#allocation4], %s428_s25, %s428_s25, %s429_s26  }
  0x13   :  { %s430_s29 = smov [#allocation6]   ;;  %s377_s7 = scalar_lea.hbm %s510_s2, 2048 }
  0x14   :  { %s31_s30 = sshll.u32 %s430_s29, 4  ;;  %p378_p8 = scmp.ne.s32.totalorder %s510_s2, %s377_s7  ;;  %s32_s30 = int_to_ptr.vmem [resolvable:$true] %s31_s30 }
  0x15   :  { %p381_p9 = scmp.lt.u32.totalorder %s377_s7, %s510_s2 }
  0x17   :  { %p383_p10 = pnand %p381_p9, %p378_p8 }
  0x19   :  { %386 = shalt.err (!%p383_p10)
}
  0x1a   :  { %s387_s12 = scalar_lea.vmem %s32_s30, 2048  ;;  %p392_p12 = scmp.lt.s32.totalorder %s32_s30, %s32_s30 }
  0x1b   :  { %p388_p11 = scmp.ne.s32.totalorder %s32_s30, %s387_s12  ;;  %p393_p13 = scmp.lt.s32.totalorder %s387_s12, %s387_s12 }
  0x1d   :  { %p394_p0 = por %p393_p13, %p392_p12 }
  0x1f   :  { %p395_p1 = pnand %p394_p0, %p388_p11 }
  0x21   :  { %398 = shalt.err (!%p395_p1)
}
  0x22   :  { %37 = dma.hbm_to_vmem [thread:$0]  %s510_s2, 2048, %s32_s30, [#allocation7], %s428_s25, %s428_s25, %s429_s26  }
  0x23   :  { %421 = dma.done.wait [#allocation4], 256  }
  0x24   :  { %422 = vsyncadd [#allocation4], 4294967040 }
  0x25   :  { %423 = dma.done.wait [#allocation7], 2048  }
  0x26   :  { %424 = vsyncadd [#allocation7], 4294965248  ;;  %v50_v0 = vld [vmem:[#allocation3] sm:$0xff]  ;;  %v51_v1 = vld [vmem:[#allocation3 + $0x8] sm:$0xff] }
  0x27   :  { %v79_v2 = vld [vmem:[#allocation6] sm:$0xff]  ;;  %v52_v3 = vmul.f32 %v50_v0, %v50_v0  ;;  %v80_v4 = vld [vmem:[#allocation6 + $0x8] sm:$0xff]  ;;  %v81_v5 = vld [vmem:[#allocation6 + $0x10] sm:$0xff]  ;;  %v53_v9 = vmul.f32 %v51_v1, %v51_v1 }
  0x28   :  { %v82_v6 = vld [vmem:[#allocation6 + $0x18] sm:$0xff]  ;;  %v306_v7 = vpack.c.bf16 %v80_v4, %v79_v2  ;;  %v83_v10 = vld [vmem:[#allocation6 + $0x20] sm:$0xff]  ;;  %v84_v11 = vld [vmem:[#allocation6 + $0x28] sm:$0xff] }
  0x29   :  { %v310_v8 = vpack.c.bf16 %v82_v6, %v81_v5  ;;  %54 = vadd.xlane.f32.xlu0 %v52_v3  ;;  %v314_v12 = vpack.c.bf16 %v84_v11, %v83_v10  ;;  %v85_v13 = vld [vmem:[#allocation6 + $0x30] sm:$0xff]  ;;  %v86_v14 = vld [vmem:[#allocation6 + $0x38] sm:$0xff]  ;;  %v87_v16 = vld [vmem:[#allocation6 + $0x40] sm:$0xff] }
  0x2a   :  { %307 = vmatprep.subr.bf16.mxu0 %v306_v7  ;;  %v318_v15 = vpack.c.bf16 %v86_v14, %v85_v13  ;;  %v88_v17 = vld [vmem:[#allocation6 + $0x48] sm:$0xff]  ;;  %v89_v19 = vld [vmem:[#allocation6 + $0x50] sm:$0xff]  ;;  %v90_v20 = vld [vmem:[#allocation6 + $0x58] sm:$0xff] }
  0x2b   :  { %309 = vmatpush3.bf16.msra.mxu0 %v306_v7  ;;  %v322_v18 = vpack.c.bf16 %v88_v17, %v87_v16  ;;  %v91_v21 = vld [vmem:[#allocation6 + $0x60] sm:$0xff]  ;;  %v326_v22 = vpack.c.bf16 %v90_v20, %v89_v19  ;;  %v92_v23 = vld [vmem:[#allocation6 + $0x68] sm:$0xff]  ;;  %v93_v25 = vld [vmem:[#allocation6 + $0x70] sm:$0xff] }
  0x2c   :  { %311 = vmatprep.subr.bf16.mxu0 %v310_v8  ;;  %v330_v24 = vpack.c.bf16 %v92_v23, %v91_v21  ;;  %v94_v26 = vld [vmem:[#allocation6 + $0x78] sm:$0xff]  ;;  %v251_v35 = vld [vmem:[%s509_s1] ss:$0 sm:$0xff]  ;;  %s431_s1 = smov [#allocation8]  }
  0x2d   :  { %56 = vadd.xlane.f32.xlu0 %v53_v9  ;;  %v334_v27 = vpack.c.bf16 %v94_v26, %v93_v25  ;;  %v252_v41 = vld [vmem:[%s511_s3] ss:$0 sm:$0xff]  ;;  %s238_s3 = sshll.u32 %s431_s1, 4  ;;  %s239_s3 = int_to_ptr.vmem [resolvable:$true] %s238_s3 }
  0x2e   :  { %s399_s17 = scalar_lea.vmem %s239_s3, 256  ;;  %p404_p3 = scmp.lt.s32.totalorder %s239_s3, %s239_s3 }
  0x2f   :  { %313 = vmatpush3.bf16.msra.mxu0 %v310_v8  ;;  %p400_p2 = scmp.ne.s32.totalorder %s239_s3, %s399_s17  ;;  %p405_p4 = scmp.lt.s32.totalorder %s399_s17, %s399_s17 }
  0x30   :  { %315 = vmatprep.subr.bf16.mxu0 %v314_v12 }
  0x31   :  { %p406_p5 = por %p405_p4, %p404_p3 }
  0x33   :  { %317 = vmatpush3.bf16.msra.mxu0 %v314_v12  ;;  %p407_p6 = pnand %p406_p5, %p400_p2 }
  0x34   :  { %319 = vmatprep.subr.bf16.mxu0 %v318_v15 }
  0x37   :  { %321 = vmatpush3.bf16.msra.mxu0 %v318_v15 }
  0x38   :  { %323 = vmatprep.subr.bf16.mxu0 %v322_v18 }
  0x3b   :  { %325 = vmatpush3.bf16.msra.mxu0 %v322_v18 }
  0x3c   :  { %327 = vmatprep.subr.bf16.mxu0 %v326_v22 }
  0x3f   :  { %329 = vmatpush3.bf16.msra.mxu0 %v326_v22 }
  0x40   :  { %331 = vmatprep.subr.bf16.mxu0 %v330_v24 }
  0x43   :  { %333 = vmatpush3.bf16.msra.mxu0 %v330_v24 }
  0x44   :  { %335 = vmatprep.subr.bf16.mxu0 %v334_v27 }
  0x47   :  { %337 = vmatpush3.bf16.msra.mxu0 %v334_v27 }
  0xb6   :  { %v55_v28 = vpop.xlane.xlu0 %54 }
  0xb7   :  { %v58_v29 = vmul.f32 0.0078125, %v55_v28 }
  0xb9   :  { %v60_v30 = vadd.f32 1e-06, %v58_v29 }
  0xba   :  { %v57_v31 = vpop.xlane.xlu0 %56 }
  0xbb   :  { %343 = vrsqrt.f32 %v60_v30  ;;  %v59_v32 = vmul.f32 0.0078125, %v57_v31 }
  0xbd   :  { %v61_v33 = vadd.f32 1e-06, %v59_v32 }
  0xbf   :  { %345 = vrsqrt.f32 %v61_v33 }
  0xc5   :  { %v344_v34 = vpop.eup %343 }
  0xc6   :  { %v64_v36 = vmul.f32 %v344_v34, %v50_v0 }
  0xc8   :  { %v73_v37 = vmul.f32 %v251_v35, %v64_v36 }
  0xc9   :  { %v346_v38 = vpop.eup %345 }
  0xca   :  { %v65_v39 = vmul.f32 %v346_v38, %v51_v1  ;;  %303 = vmatprep.mubr.f32.mxu0 %v73_v37 }
  0xcc   :  { %v74_v40 = vmul.f32 %v251_v35, %v65_v39 }
  0xce   :  { %304 = vmatmul.mubr.f32.vlgmr.msra.gmra.mrb[0].mxu0 %v74_v40 }
 0x1a1   :  { %v305_v42 = vpop.f32.mrb[0].mxu0 }
 0x1a2   :  { %v174_v43 = vadd.f32 %v305_v42, %v252_v41  ;;  %v168_v44 = vpop.f32.mrb[1].mxu0 }
 0x1a3   :  { %v169_v45 = vadd.f32 %v252_v41, %v168_v44 }
 0x1a4   :  { %v180_v46 = vmul.f32 0.70710677, %v174_v43  ;;  %v178_v25 = vmul.f32 0.5, %v174_v43 }
 0x1a5   :  { %v179_v47 = vmul.f32 0.70710677, %v169_v45  ;;  %v177_v28 = vmul.f32 0.5, %v169_v45 }
 0x1a6   :  { %v182_v48 = vand.u32 2147483647, %v180_v46  ;;  %vm222_vm0 = vcmp.ge.f32.partialorder %v180_v46, 0.0 }
 0x1a7   :  { %v181_v49 = vand.u32 2147483647, %v179_v47  ;;  %vm221_vm1 = vcmp.ge.f32.partialorder %v179_v47, 0.0 }
 0x1a8   :  { %v184_v50 = vmul.f32 0.3275911, %v182_v48  ;;  %v210_v54 = vsub.f32 0.0, %v182_v48 }
 0x1a9   :  { %v183_v51 = vmul.f32 0.3275911, %v181_v49  ;;  %v209_v55 = vsub.f32 0.0, %v181_v49 }
 0x1aa   :  { %v186_v52 = vadd.f32 1.0, %v184_v50  ;;  %v212_v57 = vmul.f32 %v210_v54, %v182_v48 }
 0x1ab   :  { %v185_v53 = vadd.f32 1.0, %v183_v51  ;;  %v211_v60 = vmul.f32 %v209_v55, %v181_v49 }
 0x1ac   :  { %347 = vrcp.f32 %v186_v52  ;;  %v215_v63 = vmul.f32 1.442695, %v212_v57 }
 0x1ad   :  { %349 = vrcp.f32 %v185_v53  ;;  %v213_v2 = vmul.f32 1.442695, %v211_v60 }
 0x1ae   :  { %351 = vpow2.f32 %v215_v63 }
 0x1af   :  { %353 = vpow2.f32 %v213_v2 }
 0x1b6   :  { %v348_v56 = vpop.eup %347 }
 0x1b7   :  { %v350_v58 = vpop.eup %349  ;;  %v192_v59 = vmul.f32 1.0614054, %v348_v56 }
 0x1b8   :  { %v191_v61 = vmul.f32 1.0614054, %v350_v58  ;;  %v352_v15 = vpop.eup %351 }
 0x1b9   :  { %v194_v62 = vadd.f32 -1.4531521, %v192_v59  ;;  %v354_v17 = vpop.eup %353 }
 0x1ba   :  { %v193_v0 = vadd.f32 -1.4531521, %v191_v61 }
 0x1bb   :  { %v196_v1 = vmul.f32 %v348_v56, %v194_v62 }
 0x1bc   :  { %v195_v3 = vmul.f32 %v350_v58, %v193_v0 }
 0x1bd   :  { %v198_v4 = vadd.f32 1.4214138, %v196_v1 }
 0x1be   :  { %v197_v5 = vadd.f32 1.4214138, %v195_v3 }
 0x1bf   :  { %v200_v6 = vmul.f32 %v348_v56, %v198_v4 }
 0x1c0   :  { %v199_v7 = vmul.f32 %v350_v58, %v197_v5 }
 0x1c1   :  { %v202_v8 = vadd.f32 -0.28449672, %v200_v6 }
 0x1c2   :  { %v201_v9 = vadd.f32 -0.28449672, %v199_v7 }
 0x1c3   :  { %v204_v10 = vmul.f32 %v348_v56, %v202_v8 }
 0x1c4   :  { %v203_v11 = vmul.f32 %v350_v58, %v201_v9 }
 0x1c5   :  { %v206_v12 = vadd.f32 0.2548296, %v204_v10 }
 0x1c6   :  { %v205_v13 = vadd.f32 0.2548296, %v203_v11 }
 0x1c7   :  { %v208_v14 = vmul.f32 %v348_v56, %v206_v12 }
 0x1c8   :  { %v207_v16 = vmul.f32 %v350_v58, %v205_v13 }
 0x1c9   :  { %v218_v18 = vmul.f32 %v352_v15, %v208_v14 }
 0x1ca   :  { %v217_v19 = vmul.f32 %v354_v17, %v207_v16 }
 0x1cb   :  { %v220_v20 = vsub.f32 1.0, %v218_v18 }
 0x1cc   :  { %v219_v21 = vsub.f32 1.0, %v217_v19 }
 0x1cd   :  { %v224_v22 = vsub.f32 0.0, %v220_v20 }
 0x1ce   :  { %v223_v23 = vsub.f32 0.0, %v219_v21 }
 0x1cf   :  { %v226_v24 = vsel %vm222_vm0, %v220_v20, %v224_v22 }
 0x1d0   :  { %v228_v26 = vadd.f32 1.0, %v226_v24  ;;  %v225_v27 = vsel %vm221_vm1, %v219_v21, %v223_v23 }
 0x1d1   :  { %v227_v29 = vadd.f32 1.0, %v225_v27 }
 0x1d2   :  { %v230_v30 = vmul.f32 %v228_v26, %v178_v25 }
 0x1d3   :  { %v229_v31 = vmul.f32 %v227_v29, %v177_v28 }
 0x1d4   :  { %232 = vst [vmem:[#allocation8 + $0x8] sm:$0xff] %v230_v30 }
 0x1d5   :  { %231 = vst [vmem:[#allocation8] sm:$0xff] %v229_v31 }
 0x1d6   :  { %410 = shalt.err (!%p407_p6)
}
 0x1d7   :  { %s411_s20 = scalar_lea.hbm %s512_s4, 256 }
 0x1d8   :  { %p412_p7 = scmp.ne.s32.totalorder %s512_s4, %s411_s20  ;;  %p415_p8 = scmp.lt.u32.totalorder %s411_s20, %s512_s4 }
 0x1da   :  { %p417_p9 = pnand %p415_p8, %p412_p7 }
 0x1dc   :  { %420 = shalt.err (!%p417_p9)
}
 0x1dd   :  { %244 = dma.vmem_to_hbm [thread:$0]  %s239_s3, 256, %s512_s4, [#allocation5], %s428_s25, %s428_s25, %s429_s26  }
 0x1de   :  { %425 = dma.done.wait [#allocation5], 256  }
 0x1df   :  { %426 = vsyncadd [#allocation5], 4294967040 }
 0x1e0   :  { %248 = vsyncpa [#allocation4], 1 }
 0x1e1   :  { %249 = vsyncpa [#allocation7], 1 }
 0x1e2   :  { %250 = vsyncpa [#allocation5], 1 }

</bundles_post_ra>
